<compile_context>
chip_gen: v6e
topology: v6e:2x2x1
jax: 0.10.0
libtpu: 0.0.40
codegen_flags: <defaults>
</compile_context>

<pallas_src>
import functools

import jax
import jax.numpy as jnp
from jax import lax
from jax.experimental import pallas as pl
from jax.experimental.pallas import tpu as pltpu


def _largest_divisor_leq(n: int, cap: int) -> int:
    for c in range(min(n, cap), 0, -1):
        if n % c == 0:
            return c
    return 1


def _row_block(m: int, cap: int) -> int:
    """Row-block size that keeps BlockSpec legal: full extent, or a divisor of m
    that is a multiple of 8 (sublane constraint on the second-to-last dim)."""
    if m <= cap:
        return m
    for c in range(cap, 7, -1):
        if m % c == 0 and c % 8 == 0:
            return c
    return m


def _softmax_last(x):
    # Lane-axis softmax with the divide pushed to the EUP (approx reciprocal).
    m = jnp.max(x, axis=-1, keepdims=True)
    e = jnp.exp(x - m)
    return e * pl.reciprocal(jnp.sum(e, axis=-1, keepdims=True), approx=True)


_MOSAIC = functools.partial(pltpu.CompilerParams, vmem_limit_bytes=64 * 1024 * 1024)


# ----------------------------------------------------------------------------
# Generic fused linear kernels (bf16 MXU inputs, f32 accumulation), row-tiled
# ----------------------------------------------------------------------------
def _linear_kernel(x_ref, w_ref, b_ref, o_ref):
    x = x_ref[...].astype(jnp.bfloat16)
    w = w_ref[...].astype(jnp.bfloat16)
    o_ref[...] = jnp.dot(x, w, preferred_element_type=jnp.float32) + b_ref[...]


def _linear_nobias_kernel(x_ref, w_ref, o_ref):
    x = x_ref[...].astype(jnp.bfloat16)
    w = w_ref[...].astype(jnp.bfloat16)
    o_ref[...] = jnp.dot(x, w, preferred_element_type=jnp.float32)


def linear(x2d, w, b=None, max_rows=256):
    M, K = x2d.shape
    N = w.shape[1]
    tm = _row_block(M, max_rows)
    grid = (M // tm,)
    x_spec = pl.BlockSpec((tm, K), lambda r: (r, 0))
    w_spec = pl.BlockSpec((K, N), lambda r: (0, 0))
    o_spec = pl.BlockSpec((tm, N), lambda r: (r, 0))
    params = _MOSAIC(dimension_semantics=("parallel",))
    if b is None:
        return pl.pallas_call(
            _linear_nobias_kernel,
            grid=grid,
            in_specs=[x_spec, w_spec],
            out_specs=o_spec,
            out_shape=jax.ShapeDtypeStruct((M, N), jnp.float32),
            compiler_params=params,
        )(x2d, w)
    return pl.pallas_call(
        _linear_kernel,
        grid=grid,
        in_specs=[x_spec, w_spec, pl.BlockSpec((1, N), lambda r: (0, 0))],
        out_specs=o_spec,
        out_shape=jax.ShapeDtypeStruct((M, N), jnp.float32),
        compiler_params=params,
    )(x2d, w, b)


# ----------------------------------------------------------------------------
# BiLSTM = hoisted input projection (big MXU matmul, grid over direction x rows)
#          + masked recurrence streamed over (direction, time-chunk) grid
# ----------------------------------------------------------------------------
def _lstm_inproj_kernel(x_ref, w_ref, b_ref, gx_ref):
    # x_ref: (tm, In)  w_ref: (1, In, 4H)  b_ref: (1, 1, 4H)  gx_ref: (1, tm, 4H)
    x = x_ref[...].astype(jnp.bfloat16)
    w = w_ref[0].astype(jnp.bfloat16)
    gx_ref[0] = jnp.dot(x, w, preferred_element_type=jnp.float32) + b_ref[0]


def _bilstm_rec_kernel(gx_ref, lens_ref, w_hh_ref,
                       out_ref, h_last_ref, c_last_ref,
                       h_scr, c_scr, *, H: int, tchunk: int):
    # gx_ref:  (1, tchunk, B, 4H)  gate pre-activations for this (direction, chunk)
    # lens_ref:(B, 1) int32        w_hh_ref: (1, H, 4H)
    # out_ref: (1, tchunk, B, H)   h_last/c_last: (1, B, H)
    d = pl.program_id(0)          # 0 = forward, 1 = backward  ("parallel" axis)
    ci = pl.program_id(1)         # time-chunk step            ("arbitrary" axis)
    nt = pl.num_programs(1)

    @pl.when(ci == 0)
    def _():
        h_scr[...] = jnp.zeros_like(h_scr)
        c_scr[...] = jnp.zeros_like(c_scr)

    # Chunk actually processed (reverse chunk order for the backward direction);
    # must match the BlockSpec index maps in `bilstm`.
    chunk = ci + d * (nt - 1 - 2 * ci)
    t0 = chunk * tchunk

    w_hh = w_hh_ref[0].astype(jnp.bfloat16)   # hoisted bf16 cast (outside the loop)
    lens = lens_ref[...]                      # (B, 1) int32

    @pl.loop(0, tchunk)
    def _(i):
        tl = i + d * (tchunk - 1 - 2 * i)     # local time index (reversed for backward)
        t = t0 + tl                           # global time index, for length masking
        h_prev = h_scr[...]
        c_prev = c_scr[...]
        gates = gx_ref[0, tl] + jnp.dot(h_prev.astype(jnp.bfloat16), w_hh,
                                        preferred_element_type=jnp.float32)
        # PyTorch gate order: i, f, g, o.
        i_g = jax.nn.sigmoid(gates[:, 0 * H:1 * H])
        f_g = jax.nn.sigmoid(gates[:, 1 * H:2 * H])
        g_g = jnp.tanh(gates[:, 2 * H:3 * H])
        o_g = jax.nn.sigmoid(gates[:, 3 * H:4 * H])
        c_new = f_g * c_prev + i_g * g_g
        h_new = o_g * jnp.tanh(c_new)
        valid = lens > t                      # packed-sequence masking
        h_scr[...] = jnp.where(valid, h_new, h_prev)
        c_scr[...] = jnp.where(valid, c_new, c_prev)
        out_ref[0, tl] = jnp.where(valid, h_new, jnp.zeros_like(h_new))

    @pl.when(ci == nt - 1)
    def _():
        h_last_ref[0] = h_scr[...]
        c_last_ref[0] = c_scr[...]


def bilstm(x, lens2d, p, max_time_chunk=64):
    """x: (T, B, In) -> encodings (T, B, 2H), last_state (B, 2H), last_cell (B, 2H)."""
    T, B, In = x.shape
    H = p['w_hh'].shape[1]
    G = 4 * H
    M = T * B

    # 1) Hoisted input projection: large bf16 MXU matmuls, grid over (direction, rows).
    tm = _row_block(M, 512)
    gx = pl.pallas_call(
        _lstm_inproj_kernel,
        grid=(2, M // tm),
        in_specs=[pl.BlockSpec((tm, In), lambda d, r: (r, 0)),
                  pl.BlockSpec((1, In, G), lambda d, r: (d, 0, 0)),
                  pl.BlockSpec((1, 1, G), lambda d, r: (d, 0, 0))],
        out_specs=pl.BlockSpec((1, tm, G), lambda d, r: (d, r, 0)),
        out_shape=jax.ShapeDtypeStruct((2, M, G), jnp.float32),
        compiler_params=_MOSAIC(dimension_semantics=("parallel", "parallel")),
    )(x.reshape(M, In), p['w_ih'], p['b'])
    gx = gx.reshape(2, T, B, G)

    # 2) Masked recurrence, streaming gate pre-activations / outputs over time chunks.
    tchunk = _largest_divisor_leq(T, max_time_chunk)
    nt = T // tchunk
    chunk_map = lambda d, ci: (d, ci + d * (nt - 1 - 2 * ci), 0, 0)
    kern = functools.partial(_bilstm_rec_kernel, H=H, tchunk=tchunk)
    out, h_last, c_last = pl.pallas_call(
        kern,
        grid=(2, nt),
        in_specs=[pl.BlockSpec((1, tchunk, B, G), chunk_map),
                  pl.BlockSpec((B, 1), lambda d, ci: (0, 0)),
                  pl.BlockSpec((1, H, G), lambda d, ci: (d, 0, 0))],
        out_specs=(pl.BlockSpec((1, tchunk, B, H), chunk_map),
                   pl.BlockSpec((1, B, H), lambda d, ci: (d, 0, 0)),
                   pl.BlockSpec((1, B, H), lambda d, ci: (d, 0, 0))),
        out_shape=(jax.ShapeDtypeStruct((2, T, B, H), jnp.float32),
                   jax.ShapeDtypeStruct((2, B, H), jnp.float32),
                   jax.ShapeDtypeStruct((2, B, H), jnp.float32)),
        scratch_shapes=[pltpu.VMEM((B, H), jnp.float32),   # h state
                        pltpu.VMEM((B, H), jnp.float32)],  # c state
        compiler_params=_MOSAIC(dimension_semantics=("parallel", "arbitrary")),
    )(gx, lens2d, p['w_hh'])

    enc = jnp.concatenate([out[0], out[1]], axis=-1)               # (T, B, 2H)
    last_state = jnp.concatenate([h_last[0], h_last[1]], axis=-1)  # (B, 2H)
    last_cell = jnp.concatenate([c_last[0], c_last[1]], axis=-1)   # (B, 2H)
    return enc, last_state, last_cell


# ----------------------------------------------------------------------------
# MatchAttention co-attention kernel (batched over batch-row chunks)
# ----------------------------------------------------------------------------
# TODO(synk): MatchAttention source not provided; standard bilinear co-attention
# (scores = edit @ W @ src^T, dual softmax, contexts), unmasked to mirror the module
# call which passes no masks/lens to the attention layer.
def _match_attn_kernel(edit_ref, proj_ref, src_ref, edit_ctx_ref, src_ctx_ref):
    edit = edit_ref[...].astype(jnp.bfloat16)     # (Bb, Te, D1)
    projb = proj_ref[...].astype(jnp.bfloat16)    # (Bb, Te, D2) = edit @ W (precomputed)
    src = src_ref[...].astype(jnp.bfloat16)       # (Bb, Ts, D2)

    # edit-side: attend over src positions (lane-axis softmax)
    scores = lax.dot_general(projb, src, (((2,), (2,)), ((0,), (0,))),
                             preferred_element_type=jnp.float32)          # (Bb, Te, Ts)
    a_edit = _softmax_last(scores)
    edit_ctx_ref[...] = lax.dot_general(a_edit.astype(jnp.bfloat16), src,
                                        (((2,), (1,)), ((0,), (0,))),
                                        preferred_element_type=jnp.float32)

    # src-side: recompute transposed scores on the MXU so the softmax is lane-axis
    # (avoids sublane softmax and an XLU transpose of a_src).
    scores_t = lax.dot_general(src, projb, (((2,), (2,)), ((0,), (0,))),
                               preferred_element_type=jnp.float32)        # (Bb, Ts, Te)
    a_src = _softmax_last(scores_t)
    src_ctx_ref[...] = lax.dot_general(a_src.astype(jnp.bfloat16), edit,
                                       (((2,), (1,)), ((0,), (0,))),
                                       preferred_element_type=jnp.float32)


def match_attention(edit_enc, src_enc, w, max_batch_block=8):
    B, Te, D1 = edit_enc.shape
    _, Ts, D2 = src_enc.shape
    # Bilinear projection hoisted into one big (B*Te, D1) @ (D1, D2) MXU matmul.
    proj = linear(edit_enc.reshape(B * Te, D1), w).reshape(B, Te, D2)
    bblk = _largest_divisor_leq(B, max_batch_block)
    bmap = lambda i: (i, 0, 0)
    return pl.pallas_call(
        _match_attn_kernel,
        grid=(B // bblk,),
        in_specs=[pl.BlockSpec((bblk, Te, D1), bmap),
                  pl.BlockSpec((bblk, Te, D2), bmap),
                  pl.BlockSpec((bblk, Ts, D2), bmap)],
        out_specs=(pl.BlockSpec((bblk, Te, D2), bmap),
                   pl.BlockSpec((bblk, Ts, D1), bmap)),
        out_shape=(jax.ShapeDtypeStruct((B, Te, D2), jnp.float32),
                   jax.ShapeDtypeStruct((B, Ts, D1), jnp.float32)),
        compiler_params=_MOSAIC(dimension_semantics=("parallel",)),
    )(edit_enc, proj, src_enc)


# ----------------------------------------------------------------------------
# 8-head selfAttention: fused QKV projection kernel + head-batched SDPA kernel
# ----------------------------------------------------------------------------
# TODO(synk): selfAttention source not provided; standard 8-head scaled-dot-product
# attention with fused Q/K/V linear projections (no output projection), unmasked to
# mirror the module call which passes no masks.
def _mha_kernel(q_ref, k_ref, v_ref, o_ref, *, scale: float):
    q = (q_ref[0] * scale).astype(jnp.bfloat16)   # scale folded into Q (T*dk muls)
    k = k_ref[0].astype(jnp.bfloat16)             # (nh, T, dk)
    v = v_ref[0].astype(jnp.bfloat16)
    s = lax.dot_general(q, k, (((2,), (2,)), ((0,), (0,))),
                        preferred_element_type=jnp.float32)               # (nh, T, T)
    a = _softmax_last(s)
    o_ref[0] = lax.dot_general(a.astype(jnp.bfloat16), v,
                               (((2,), (1,)), ((0,), (0,))),
                               preferred_element_type=jnp.float32)        # (nh, T, dk)


def self_attention(x, p, num_heads):
    B, T, D = x.shape
    dk = D // num_heads
    # Fused QKV projection: one (B*T, D) @ (D, 3D) MXU matmul.
    qkv = linear(x.reshape(B * T, D), p['wqkv'], p['bqkv'])               # (B*T, 3D)
    # Layout glue (outside the kernel): split heads with heads leading, dk on lanes.
    qkv = qkv.reshape(B, T, 3, num_heads, dk)
    qkv = jnp.transpose(qkv, (2, 0, 3, 1, 4))                             # (3, B, nh, T, dk)
    q, k, v = qkv[0], qkv[1], qkv[2]

    hspec = pl.BlockSpec((1, num_heads, T, dk), lambda b: (b, 0, 0, 0))
    out_h = pl.pallas_call(
        functools.partial(_mha_kernel, scale=1.0 / float(dk) ** 0.5),
        grid=(B,),
        in_specs=[hspec, hspec, hspec],
        out_specs=hspec,
        out_shape=jax.ShapeDtypeStruct((B, num_heads, T, dk), jnp.float32),
        compiler_params=_MOSAIC(dimension_semantics=("parallel",)),
    )(q, k, v)
    return jnp.transpose(out_h, (0, 2, 1, 3)).reshape(B, T, D)


# ----------------------------------------------------------------------------
# Glue: masks, embeddings, full forward
# ----------------------------------------------------------------------------
# TODO(synk): get_sent_masks source not provided; standard convention is 1.0 at padded
# positions, 0.0 at valid positions.
def get_sent_masks(max_len, lens):
    return (jnp.arange(max_len)[None, :] >= lens[:, None]).astype(jnp.float32)


def coattn_encoder_forward(params, code_a, code_b, action, code_lens, src, src_lens,
                           max_time_chunk=64):
    # Embedding lookups (glue; plain gather).
    code_a_ems = jnp.take(params['code_embed'], code_a, axis=0)    # (Tc, B, E)
    code_b_ems = jnp.take(params['code_embed'], code_b, axis=0)
    action_ems = jnp.take(params['action_embed'], action, axis=0)
    src_ems = jnp.take(params['nl_embed'], src, axis=0)            # (Ts, B, E)

    code_lens2 = code_lens[:, None].astype(jnp.int32)
    src_lens2 = src_lens[:, None].astype(jnp.int32)

    # Context layer (EditNLEncodeLayer): two BiLSTMs.
    edit_ems = jnp.concatenate([code_a_ems, code_b_ems, action_ems], axis=-1)
    c_edit_enc, _, _ = bilstm(edit_ems, code_lens2, params['edit_rnn'], max_time_chunk)
    c_src_enc, _, _ = bilstm(src_ems, src_lens2, params['nl_rnn'], max_time_chunk)
    c_edit_enc = jnp.transpose(c_edit_enc, (1, 0, 2))              # (B, Tc, edit_vec)
    c_src_enc = jnp.transpose(c_src_enc, (1, 0, 2))                # (B, Ts, 2*enc_hidden)

    Tc = c_edit_enc.shape[1]
    Ts = c_src_enc.shape[1]
    edit_sent_masks = get_sent_masks(Tc, code_lens)
    src_sent_masks = get_sent_masks(Ts, src_lens)

    # Co-attention.
    edit_ctx, src_ctx = match_attention(c_edit_enc, c_src_enc, params['match_w'])

    # Modeling layers (batch_first BiLSTMs) over [encodings ; attended ctx].
    edit_mod_in = jnp.transpose(jnp.concatenate([c_edit_enc, edit_ctx], axis=-1), (1, 0, 2))
    edit_enc, edit_state, edit_cell = bilstm(edit_mod_in, code_lens2,
                                             params['edit_modeling'], max_time_chunk)
    edit_enc = jnp.transpose(edit_enc, (1, 0, 2))                  # (B, Tc, 2*enc_hidden)

    src_mod_in = jnp.transpose(jnp.concatenate([c_src_enc, src_ctx], axis=-1), (1, 0, 2))
    src_enc, src_state, src_cell = bilstm(src_mod_in, src_lens2,
                                          params['nl_modeling'], max_time_chunk)
    src_enc = jnp.transpose(src_enc, (1, 0, 2))                    # (B, Ts, 2*enc_hidden)

    # 8-head self attention over edit encodings.
    edit_enc = self_attention(edit_enc, params['self_attn'], num_heads=8)

    return (edit_enc, edit_state, edit_cell, edit_sent_masks,
            src_enc, src_state, src_cell, src_sent_masks)


# ----------------------------------------------------------------------------
# Deterministic parameter initialization (synthetic; not loaded from files)
# ----------------------------------------------------------------------------
def _lstm_params(key, in_size, hidden, scale=0.1):
    # Direction-stacked weights: index 0 = forward, 1 = backward.
    # Single folded bias (PyTorch b_ih + b_hh combined).
    ks = jax.random.split(key, 3)
    n = lambda k, s: jax.random.normal(k, s, jnp.float32) * scale
    return {
        'w_ih': n(ks[0], (2, in_size, 4 * hidden)),
        'w_hh': n(ks[1], (2, hidden, 4 * hidden)),
        'b': n(ks[2], (2, 1, 4 * hidden)),
    }


def init_params(key, *, Vc, Va, Vn, E, edit_vec, enc_hidden, scale=0.1):
    ks = jax.random.split(key, 10)
    n = lambda k, s: jax.random.normal(k, s, jnp.float32) * scale
    ctx_out = edit_vec + 2 * enc_hidden       # context_layer.output_size
    attn_dim = 2 * enc_hidden                 # selfAttention input/hidden size
    return {
        'code_embed': n(ks[0], (Vc, E)).at[0].set(0.0),    # padding_idx = 0
        'action_embed': n(ks[1], (Va, E)).at[0].set(0.0),
        'nl_embed': n(ks[2], (Vn, E)).at[0].set(0.0),
        'edit_rnn': _lstm_params(ks[3], 3 * E, edit_vec // 2),
        'nl_rnn': _lstm_params(ks[4], E, enc_hidden),
        'edit_modeling': _lstm_params(ks[5], ctx_out, enc_hidden),
        'nl_modeling': _lstm_params(ks[6], ctx_out, enc_hidden),
        'match_w': n(ks[7], (edit_vec, 2 * enc_hidden)),
        'self_attn': {
            'wqkv': n(ks[8], (attn_dim, 3 * attn_dim)),
            'bqkv': jnp.zeros((1, 3 * attn_dim), jnp.float32),
        },
    }


if __name__ == "__main__":
    # Small shapes consistent with the module.
    B = 2
    Tc, Ts = 8, 10                 # code-edit / nl sequence lengths
    E = 16                         # embed_size
    enc_hidden = 16                # enc_hidden_size -> modeling output 32
    edit_vec = 32                  # edit_vec_size (== 2*enc_hidden, as in the 512/512 config)
    Vc, Va, Vn = 50, 12, 40        # vocab sizes

    key = jax.random.PRNGKey(0)
    pkey, dkey = jax.random.split(key)
    params = init_params(pkey, Vc=Vc, Va=Va, Vn=Vn, E=E,
                         edit_vec=edit_vec, enc_hidden=enc_hidden)

    k1, k2, k3, k4 = jax.random.split(dkey, 4)
    code_a = jax.random.randint(k1, (Tc, B), 1, Vc, dtype=jnp.int32)
    code_b = jax.random.randint(k2, (Tc, B), 1, Vc, dtype=jnp.int32)
    action = jax.random.randint(k3, (Tc, B), 1, Va, dtype=jnp.int32)
    src = jax.random.randint(k4, (Ts, B), 1, Vn, dtype=jnp.int32)
    code_lens = jnp.array([8, 5], dtype=jnp.int32)
    src_lens = jnp.array([10, 7], dtype=jnp.int32)

    # max_time_chunk=5 exercises the multi-chunk (streamed) recurrence path on the
    # demo lengths (Tc=8 -> chunks of 4, Ts=10 -> chunks of 5).
    outs = coattn_encoder_forward(params, code_a, code_b, action, code_lens,
                                  src, src_lens, max_time_chunk=5)
    jax.block_until_ready(outs)

    (edit_enc, edit_state, edit_cell, edit_masks,
     src_enc, src_state, src_cell, src_masks) = outs
    assert edit_enc.shape == (B, Tc, 2 * enc_hidden)
    assert edit_state.shape == (B, 2 * enc_hidden)
    assert edit_cell.shape == (B, 2 * enc_hidden)
    assert edit_masks.shape == (B, Tc)
    assert src_enc.shape == (B, Ts, 2 * enc_hidden)
    assert src_state.shape == (B, 2 * enc_hidden)
    assert src_cell.shape == (B, 2 * enc_hidden)
    assert src_masks.shape == (B, Ts)
    for o in (edit_enc, edit_state, edit_cell, src_enc, src_state, src_cell):
        assert bool(jnp.all(jnp.isfinite(o)))
    print("KERNEL_OK")
</pallas_src>

<mosaic_0001>
module attributes {stable_mosaic.version = 11 : i64} {
  func.func @_lstm_inproj_kernel(%arg0: i32, %arg1: i32, %arg2: memref<16x48xf32, #tpu.memory_space<vmem>>, %arg3: memref<1x48x64xf32, #tpu.memory_space<vmem>>, %arg4: memref<1x1x64xf32, #tpu.memory_space<vmem>>, %arg5: memref<1x16x64xf32, #tpu.memory_space<vmem>>) attributes {dimension_semantics = [#tpu.dimension_semantics<parallel>, #tpu.dimension_semantics<parallel>], iteration_bounds = array<i64: 2, 1>, scalar_prefetch = 0 : i64, scratch_operands = 0 : i64, tpu.core_type = #tpu.core_type<tc>, window_params = [{transform_indices = @transform_0, window_bounds = array<i64: 16, 48>}, {transform_indices = @transform_1, window_bounds = array<i64: 1, 48, 64>}, {transform_indices = @transform_2, window_bounds = array<i64: 1, 1, 64>}, {transform_indices = @transform_3, window_bounds = array<i64: 1, 16, 64>}]} {
    %c0 = arith.constant 0 : index
    %c0_0 = arith.constant 0 : index
    %0 = vector.load %arg2[%c0, %c0_0] : memref<16x48xf32, #tpu.memory_space<vmem>>, vector<16x48xf32>
    %1 = arith.truncf %0 : vector<16x48xf32> to vector<16x48xbf16>
    %c0_1 = arith.constant 0 : index
    %c0_2 = arith.constant 0 : index
    %c0_3 = arith.constant 0 : index
    %2 = vector.load %arg3[%c0_1, %c0_2, %c0_3] : memref<1x48x64xf32, #tpu.memory_space<vmem>>, vector<1x48x64xf32>
    %3 = vector.shape_cast %2 : vector<1x48x64xf32> to vector<48x64xf32>
    %4 = arith.truncf %3 : vector<48x64xf32> to vector<48x64xbf16>
    %cst = arith.constant dense<0.000000e+00> : vector<16x64xf32>
    %5 = tpu.matmul %1, %4, %cst {dimension_numbers = #tpu.dot_dimension_numbers<[1], [0], [0], [1], [0, 0, 1, 1], [], []>} : vector<16x48xbf16>, vector<48x64xbf16>, vector<16x64xf32> -> vector<16x64xf32>
    %c0_4 = arith.constant 0 : index
    %c0_5 = arith.constant 0 : index
    %c0_6 = arith.constant 0 : index
    %6 = vector.load %arg4[%c0_4, %c0_5, %c0_6] : memref<1x1x64xf32, #tpu.memory_space<vmem>>, vector<1x1x64xf32>
    %7 = vector.shape_cast %6 : vector<1x1x64xf32> to vector<1x64xf32>
    %8 = vector.broadcast %7 : vector<1x64xf32> to vector<16x64xf32>
    %9 = arith.addf %5, %8 : vector<16x64xf32>
    %c0_7 = arith.constant 0 : index
    %c0_8 = arith.constant 0 : index
    %c0_9 = arith.constant 0 : index
    %10 = vector.load %arg5[%c0_7, %c0_8, %c0_9] : memref<1x16x64xf32, #tpu.memory_space<vmem>>, vector<1x16x64xf32>
    %11 = vector.shape_cast %10 : vector<1x16x64xf32> to vector<16x64xf32>
    %12 = vector.shape_cast %9 : vector<16x64xf32> to vector<1x16x64xf32>
    tpu.vector_store %arg5[%c0_7, %c0_8, %c0_9], %12 {strides = array<i32>} : memref<1x16x64xf32, #tpu.memory_space<vmem>>, vector<1x16x64xf32>,
    return
  }
  func.func @transform_0(%arg0: i32, %arg1: i32) -> (i32, i32) {
    %c0_i32 = arith.constant 0 : i32
    %c0_i32_0 = arith.constant 0 : i32
    return %arg1, %c0_i32 : i32, i32
  }
  func.func @transform_1(%arg0: i32, %arg1: i32) -> (i32, i32, i32) {
    %c0_i32 = arith.constant 0 : i32
    %c0_i32_0 = arith.constant 0 : i32
    %c0_i32_1 = arith.constant 0 : i32
    return %arg0, %c0_i32, %c0_i32_0 : i32, i32, i32
  }
  func.func @transform_2(%arg0: i32, %arg1: i32) -> (i32, i32, i32) {
    %c0_i32 = arith.constant 0 : i32
    %c0_i32_0 = arith.constant 0 : i32
    %c0_i32_1 = arith.constant 0 : i32
    return %arg0, %c0_i32, %c0_i32_0 : i32, i32, i32
  }
  func.func @transform_3(%arg0: i32, %arg1: i32) -> (i32, i32, i32) {
    %c0_i32 = arith.constant 0 : i32
    %c0_i32_0 = arith.constant 0 : i32
    return %arg0, %arg1, %c0_i32 : i32, i32, i32
  }
}

</mosaic_0001>

<bundles_post_ra>
// kernel: tpu_custom_call.1
= control target key start
LH: loop header
LB: loop body
LE: loop exit
PB: predicated region body
PF: predicated region fallthrough
CT: control target
= control target key end

     0   :  { %8 = vsyncpa [#allocation3], 0  ;;  %s902_s0 = inlined_call_operand.hbm [shape: f32[16,48], index: 0, kind: input, shape index: {}]   ;;  %s903_s1 = inlined_call_operand.hbm [shape: f32[2,48,64], index: 1, kind: input, shape index: {}]   ;;  %s904_s2 = inlined_call_operand.vmem [shape: f32[2,1,64], index: 2, kind: input, shape index: {}]   ;;  %s905_s3 = inlined_call_operand.hbm [shape: f32[2,16,64], index: 3, kind: output, shape index: {}]  }
   0x1   :  { %9 = vsyncpa [#allocation6], 0 }
   0x2   :  { %11 = vsyncpa [#allocation6 + $0x1], 0 }
   0x3   :  { %12 = vsyncpa [#allocation4], 0 }
   0x4   :  { %14 = vsyncpa [#allocation4 + $0x1], 0  ;;  %s715_s12 = smov 0   ;;  %s717_s13 = smov 0  }
   0x5   :  { %s719_s14 = smov 0   ;;  %s721_s15 = smov 0  }
   0x6   :  { %s723_s16 = smov 0   ;;  %s725_s17 = smov 0  }
   0x7 LB: > { %s433_s18 = sadd.s32 4294967295, %s684_s17   ;;  %s434_s19 = sadd.s32 4294967294, %s684_s17   ;;  %s684_s17 = sphi %s725_s17, %s20_s17   ;;  %s680_s16 = sphi %s723_s16, %s921_s16   ;;  %s676_s15 = sphi %s721_s15, %s920_s15   ;;  %s672_s14 = sphi %s719_s14, %s919_s14   ;;  %s668_s13 = sphi %s717_s13, %s918_s13   ;;  %s664_s12 = sphi %s715_s12, %s917_s12  }
   0x8   : > { %p78_p0 = scmp.ne.s32.totalorder %s668_s13, %s664_s12  ;;  %p749_p1 = scmp.eq.s32.totalorder %s433_s18, 0 }
   0x9   : > { %p753_p2 = scmp.eq.s32.totalorder %s433_s18, 1  ;;  %p136_p3 = scmp.eq.s32.totalorder %s434_s19, 1 }
   0xa   : > { %p759_p4 = por %p749_p1, %p78_p0  ;;  %p435_p5 = scmp.ge.s32.totalorder %s684_s17, 1 }
   0xb   : > { %p764_p6 = por %p136_p3, %p78_p0  ;;  %p143_p7 = scmp.lt.s32.totalorder %s684_s17, 3 }
   0xc   : > { %s909_s22 = scalar_select %p759_p4, 1, 0 }
   0xd   : > { %s910_s23 = scalar_select %p764_p6, 1, 0 }
   0xe   : > { %p769_p8 = pnand %p435_p5, %p143_p7  ;;  %s686_s25 = smov [#allocation2]  }
   0xf   : > { %s158_s26 = sshll.u32 %s686_s25, 4  ;;  %p437_p10 = scmp.ge.s32.totalorder %s684_s17, 2  ;;  %s159_s26 = int_to_ptr.vmem [resolvable:$true] %s158_s26 }
  0x10   : > { %p475_p9 = pneg %p769_p8  ;;  %s32_s28 = sadd.s32 1, %s680_s16 }
  0x11   : > { %s557_s29 = scalar_lea.vmem %s159_s26, 256  ;;  %p565_p5 = scmp.lt.s32.totalorder %s159_s26, %s159_s26 }
  0x12   : > { %p778_p11 = pnand %p475_p9, %p749_p1  ;;  %p558_p13 = scmp.ne.s32.totalorder %s159_s26, %s557_s29 }
  0x13   : > { %p566_p7 = scmp.lt.s32.totalorder %s557_s29, %s557_s29 }
  0x14   : > { %p548_p12 = pneg %p778_p11 }
  0x15   : > { %p567_p6 = por %p566_p7, %p565_p5 }
  0x16   : > { %p560_p0 = pnand %p558_p13, %p548_p12 }
  0x18   : > { %p561_p3 = pneg %p560_p0 }
  0x1a   : > { %p568_p4 = pnand %p567_p6, %p561_p3 }
  0x1c   : > { %571 = shalt.err (!%p568_p4)
}
  0x1d   : > { %s687_s30 = smov 128   ;;  %s688_s4 = smov 8  }
  0x1e   : > { %478 = dma.hbm_to_vmem [thread:$0]  (!%p778_p11), %s902_s0, 256, %s159_s26, [#allocation3], %s687_s30, %s687_s30, %s688_s4  }
  0x1f   : > { %p34_p4 = scmp.ge.s32.totalorder %s32_s28, 2  ;;  %s65_s7 = sadd.s32 1, %s672_s14 }
  0x20   : > { %p72_p6 = scmp.ne.s32.totalorder %s672_s14, %s668_s13  ;;  %p73_p9 = scmp.eq.s32.totalorder %s684_s17, 0 }
  0x21   : > { %s923_s28 = smov (%p34_p4, %s32_s28), 0  ;;  %p488_p0 = scmp.lt.s32.totalorder %s684_s17, 2 }
  0x22   : > { %p74_p12 = por %p73_p9, %p72_p6  ;;  %p801_p13 = por %p753_p2, %p72_p6 }
  0x23   : > { %s62_s9 = ssub.s32 %s680_s16, %s923_s28  ;;  %s172_s10 = sand.u32 1, %s672_s14  }
  0x24   : > { %p63_p3 = scmp.eq.s32.totalorder %s62_s9, 0  ;;  %s464_s11 = smul.u32 48, %s172_s10 }
  0x25   : > { %s465_s19 = smul.u32 768, %s680_s16  ;;  %p813_p11 = pnand %p488_p0, %p74_p12 }
  0x26   : > { %s810_s18 = scalar_select %p63_p3, %s672_s14, %s65_s7  }
  0x27   : > { %s176_s25 = scalar_lea.vmem [#allocation5], %s464_s11  ;;  %s182_s5 = scalar_lea.hbm %s903_s1, %s465_s19 }
  0x28   : > { %s183_s26 = sshll.u32 %s176_s25, 4  ;;  %s173_s6 = scalar_lea.sflag [#allocation6], %s172_s10  ;;  %s184_s26 = int_to_ptr.vmem [resolvable:$true] %s183_s26 }
  0x29   : > { %p574_p2 = pneg %p813_p11  ;;  %s585_s9 = scalar_lea.vmem %s184_s26, 768 }
  0x2a   : > { %p586_p5 = scmp.ne.s32.totalorder %s184_s26, %s585_s9  ;;  %s689_s7 = smov [#allocation5]  }
  0x2b   : > { %s590_s11 = sshll.u32 %s689_s7, 4  ;;  %s591_s11 = int_to_ptr.vmem [resolvable:$false] %s590_s11 }
  0x2c   : > { %p588_p7 = pnand %p586_p5, %p574_p2  ;;  %s592_s25 = scalar_lea.vmem %s591_s11, 1536 }
  0x2d   : > { %p593_p6 = scmp.lt.s32.totalorder %s184_s26, %s591_s11  ;;  %p594_p9 = scmp.lt.s32.totalorder %s592_s25, %s585_s9 }
  0x2e   : > { %p589_p4 = pneg %p588_p7 }
  0x2f   : > { %p595_p12 = por %p594_p9, %p593_p6 }
  0x31   : > { %p596_p0 = pnand %p595_p12, %p589_p4 }
  0x33   : > { %599 = shalt.err (!%p596_p0)
}
  0x34   : > { %482 = dma.hbm_to_vmem [thread:$0]  (!%p813_p11), %s182_s5, 768, %s184_s26, %s173_s6, %s687_s30, %s687_s30, %s688_s4  }
  0x35   : > { %201 = sbr.rel (%p769_p8) target bundleno = 291 (0x123), region = 32 }
  0x3a   : > { %651 = dma.done.wait (%p749_p1), [#allocation3], 256  }
  0x3b   : > { %653 = vsyncadd (%p749_p1), [#allocation3], 4294967040  ;;  %s834_s10 = sand.u32 1, %s668_s13   ;;  %p915_p3 = scmp.ne.s32.totalorder %s909_s22, 0 }
  0x3c   : > { %s466_s19 = smul.u32 48, %s834_s10  ;;  %s208_s27 = scalar_lea.sflag [#allocation6], %s834_s10 }
  0x3e   : > { %s211_s29 = scalar_lea.vmem [#allocation5], %s466_s19 }
  0x3f   : > { %655 = dma.done.wait (%p915_p3), %s208_s27, 768  }
  0x40   : > { %657 = vsyncadd (%p915_p3), %s208_s27, 4294966528  ;;  %v690_v0 = vmov 0.0   ;;  %vm691_vm0 = vmmov 0   ;;  %v250_v1 = vld [vmem:[%s211_s29 + $0x20] sm:$0xff]  ;;  %v251_v2 = vld [vmem:[%s211_s29 + $0x28] sm:$0xff]  ;;  %vm262_vm1 = vcmask 392192  }
  0x41   : > { %454 = vmatprep.subr.bf16.mxu0 %v690_v0  ;;  %460 = vmatprep.mubr.msk.bf16.mxu0 %vm691_vm0, %v690_v0  ;;  %v248_v3 = vld [vmem:[%s211_s29 + $0x10] sm:$0xff]  ;;  %v254_v4 = vpack.c.bf16 %v251_v2, %v250_v1  ;;  %v249_v5 = vld [vmem:[%s211_s29 + $0x18] sm:$0xff]  ;;  %v246_v7 = vld [vmem:[%s211_s29] sm:$0xff]  ;;  %p238_p1 = scmp.lt.s32.totalorder %s676_s15, 1  ;;  %s441_s4 = sshll.u32 %s834_s10, 4  ;;  %vm307_vm2 = vcmask 523264  }
  0x42   : > { %v253_v6 = vpack.c.bf16 %v249_v5, %v248_v3  ;;  %v247_v8 = vld [vmem:[%s211_s29 + $0x8] sm:$0xff]  ;;  %v243_v10 = vld [vmem:[#allocation2] sm:$0xff]  ;;  %s236_s26 = scalar_lea.vmem [#allocation7], %s441_s4  ;;  %s449_s5 = sshll.u32 %s676_s15, 8 }
  0x43   : > { %455 = vmatpush3.bf16.msra.mxu0 %v254_v4  ;;  %v252_v9 = vpack.c.bf16 %v247_v8, %v246_v7  ;;  %v244_v11 = vld [vmem:[#allocation2 + $0x8] sm:$0xff]  ;;  %s239_s20 = scalar_select %p238_p1, %s676_s15, 1 }
  0x44   : > { %456 = vmatprep.subr.bf16.mxu0 %v690_v0  ;;  %v245_v12 = vpack.c.bf16 %v244_v11, %v243_v10  ;;  %s326_s21 = sshll.u32 %s236_s26, 4  ;;  %s854_s7 = scalar_lea.hbm %s905_s3, %s449_s5  ;;  %s849_s21 = int_to_ptr.vmem [resolvable:$true] %s326_s21 }
  0x45   : > { %s240_s30 = scalar_lea.vmem %s904_s2, %s239_s20  ;;  %s311_s11 = scalar_lea.sflag [#allocation4], %s834_s10 }
  0x46   : > { %v442_v13 = vld [vmem:[%s240_s30] ss:$0 sm:$0xff]  ;;  %s600_s25 = scalar_lea.vmem %s849_s21, 256  ;;  %s692_s15 = smov [#allocation7]  }
  0x47   : > { %457 = vmatpush3.bf16.msra.mxu0 %v253_v6  ;;  %p601_p8 = scmp.ne.s32.totalorder %s849_s21, %s600_s25  ;;  %s604_s19 = sshll.u32 %s692_s15, 4  ;;  %s605_s19 = int_to_ptr.vmem [resolvable:$false] %s604_s19 }
  0x48   : > { %458 = vmatprep.subr.bf16.mxu0 %v690_v0  ;;  %s606_s27 = scalar_lea.vmem %s605_s19, 512  ;;  %p607_p5 = scmp.lt.s32.totalorder %s849_s21, %s605_s19 }
  0x49   : > { %p602_p11 = pnand %p601_p8, %p801_p13  ;;  %p608_p7 = scmp.lt.s32.totalorder %s606_s27, %s600_s25 }
  0x4b   : > { %459 = vmatpush3.bf16.msra.mxu0 %v252_v9  ;;  %p603_p2 = pneg %p602_p11  ;;  %p609_p4 = por %p608_p7, %p607_p5 }
  0x4d   : > { %p610_p6 = pnand %p609_p4, %p603_p2 }
  0x4e   : > { %461 = vmatmul.mubr.msk.bf16.vlgmr.msra.gmra.mxu0 %vm262_vm1, %v245_v12 }
 0x10e   : > { %v300_v14 = vpop.f32.mrf.mxu0 }
 0x10f   : > { %v301_v15 = vadd.f32 %v442_v13, %v300_v14 }
 0x110   : > { %v462_v16 = vpop.f32.mrf.mxu0 }
 0x111   : > { %308 = vst.msk [vmem:[%s236_s26] sm:$0xff] %vm307_vm2, %v301_v15 }
 0x112   : > { %v303_v17 = vpop.f32.mrf.mxu0 }
 0x113   : > { %v304_v18 = vadd.f32 %v442_v13, %v303_v17 }
 0x114   : > { %v463_v19 = vpop.f32.mrf.mxu0 }
 0x115   : > { %309 = vst.msk [vmem:[%s236_s26 + $0x8] sm:$0xff] %vm307_vm2, %v304_v18 }
 0x116   : > { %613 = shalt.err (!%p610_p6)
}
 0x117   : > { %s614_s29 = scalar_lea.hbm %s854_s7, 256  ;;  %s618_s24 = scalar_lea.hbm %s905_s3, 512 }
 0x118   : > { %p615_p9 = scmp.ne.s32.totalorder %s854_s7, %s614_s29  ;;  %p619_p3 = scmp.lt.s32.totalorder %s854_s7, %s905_s3 }
 0x119   : > { %p620_p1 = scmp.lt.s32.totalorder %s618_s24, %s614_s29 }
 0x11a   : > { %p616_p12 = pnand %p615_p9, %p801_p13 }
 0x11b   : > { %p621_p8 = por %p620_p1, %p619_p3 }
 0x11c   : > { %p617_p0 = pneg %p616_p12 }
 0x11e   : > { %p622_p11 = pnand %p621_p8, %p617_p0 }
 0x120   : > { %625 = shalt.err (!%p622_p11)
}
 0x121   : > { %s693_s26 = smov 128   ;;  %s694_s5 = smov 8  }
 0x122   : > { %473 = dma.vmem_to_hbm [thread:$0]  (%p801_p13), %s849_s21, 256, %s854_s7, %s311_s11, %s693_s26, %s693_s26, %s694_s5  }
 0x123 PF: > { %s341_s6 = sand.u32 1, %s664_s12   ;;  %p916_p2 = scmp.ne.s32.totalorder %s910_s23, 0 }
 0x124   : > { %s342_s9 = scalar_lea.sflag [#allocation4], %s341_s6 }
 0x125   : > { %p484_p5 = pnand %p437_p10, %p916_p2 }
 0x127   : > { %p485_p7 = pneg %p484_p5 }
 0x129   : > { %659 = dma.done.wait (%p485_p7), %s342_s9, 256  }
 0x12a   : > { %661 = vsyncadd (%p485_p7), %s342_s9, 4294967040  ;;  %s20_s17 = sadd.s32 1, %s684_s17   ;;  %s917_s12 = smov %s668_s13 }
 0x12b   : > { %p17_p4 = scmp.ge.s32.totalorder %s20_s17, 4   ;;  %s918_s13 = smov %s672_s14 }
 0x12c   : > { %s919_s14 = smov %s810_s18  ;;  %s920_s15 = smov %s680_s16 }
 0x12d   : > { %s921_s16 = smov %s923_s28  ;;  %19 = sbr.rel (!%p17_p4) target bundleno = 7 (0x7), region = 86 }
 0x132   :  { %347 = vsyncpa [#allocation3], 1 }
 0x133   :  { %349 = vsyncpa [#allocation3 + $0x1], 1 }
 0x134   :  { %350 = vsyncpa [#allocation6], 1 }
 0x135   :  { %352 = vsyncpa [#allocation6 + $0x1], 1 }
 0x136   :  { %353 = vsyncpa [#allocation4], 1 }
 0x137   :  { %355 = vsyncpa [#allocation4 + $0x1], 1 }

</bundles_post_ra>
